<compile_context>
chip_gen: v7x
topology: tpu7x:2x2x1
jax: 0.10.0
libtpu: 0.0.40
codegen_flags: <defaults>
</compile_context>

<pallas_src>
import functools

import jax
import jax.numpy as jnp
from jax.experimental import pallas as pl
from jax.experimental.pallas import tpu as pltpu


def _custom_head_kernel(x_ref, w_ref, bias_ref, out_ref):
    """One grid step = one batch tile.

    x_ref    : VMEM (B_tile, D*T)   contiguous backbone features (eta folded into W)
    w_ref    : VMEM (D*T, O)        eta-scaled, pre-transposed shared weight
    bias_ref : VMEM (1, O)          combined bias = eta.sum() * b + T0  (f32)
    out_ref  : VMEM (B_tile, O)
    """
    y = jnp.dot(x_ref[...], w_ref[...], preferred_element_type=jnp.float32)
    out_ref[...] = (y + bias_ref[...]).astype(out_ref.dtype)


def _round_up(x, m):
    return -(-x // m) * m


@functools.partial(jax.jit, static_argnames=("compute_dtype", "b_tile"))
def custom_head_forward(backbone_features, weight, bias, eta, t0,
                        compute_dtype=jnp.float32, b_tile=None):
    """backbone_features: (B, D, T) as in PyTorch. weight: (O, D). bias: (O,).
    eta: (T,). t0: (O,). Returns (B, O) float32."""
    B, D, T = backbone_features.shape
    O = weight.shape[0]
    K = D * T

    # ---- wrapper-side glue (tiny, weight-sized; no activation movement) -----
    # W_exp[d*T + t, o] = eta[t] * weight[o, d]  — matches the row-major reshape
    # of x: x2d[b, d*T + t] = x[b, d, t].
    w_exp = (weight.astype(jnp.float32).T[:, None, :]
             * eta.astype(jnp.float32)[None, :, None]).reshape(K, O)
    combined_bias = (jnp.sum(eta.astype(jnp.float32)) * bias.astype(jnp.float32)
                     + t0.astype(jnp.float32)).reshape(1, O)

    x2d = backbone_features.reshape(B, K)           # contiguous reshape — free
    x2d = x2d.astype(compute_dtype)
    w_exp = w_exp.astype(compute_dtype)

    # ---- batch tiling --------------------------------------------------------
    # Tile = multiple of 8 sublanes; cap at 512 rows (f32 row = K*4 bytes = 1 KiB,
    # so 512-row double-buffered input tiles stay far under v7x's 32 MiB scoped VMEM).
    if b_tile is None:
        b_tile = 512 if B >= 512 else _round_up(B, 8)
    b_tile = max(8, _round_up(b_tile, 8))
    padded_B = _round_up(B, b_tile)
    if padded_B != B:
        x2d = jnp.pad(x2d, ((0, padded_B - B), (0, 0)))
    grid = (padded_B // b_tile,)

    itemsize = jnp.dtype(compute_dtype).itemsize
    cost = pl.CostEstimate(
        flops=2 * padded_B * K * O,
        transcendentals=0,
        bytes_accessed=padded_B * K * itemsize + K * O * itemsize + padded_B * O * 4,
    )

    out_padded = pl.pallas_call(
        _custom_head_kernel,
        out_shape=jax.ShapeDtypeStruct((padded_B, O), jnp.float32),
        grid=grid,
        in_specs=[
            pl.BlockSpec((b_tile, K), lambda i: (i, 0)),   # x: tiled over batch
            pl.BlockSpec((K, O), lambda i: (0, 0)),        # W_exp: VMEM-resident
            pl.BlockSpec((1, O), lambda i: (0, 0)),        # folded bias: VMEM-resident
        ],
        out_specs=pl.BlockSpec((b_tile, O), lambda i: (i, 0)),
        compiler_params=pltpu.CompilerParams(
            dimension_semantics=("parallel",),
        ),
        cost_estimate=cost,
    )(x2d, w_exp, combined_bias)

    return out_padded[:B]


def custom_head_reference(backbone_features, weight, bias, eta, t0):
    """Pure-JAX reference mirroring the PyTorch forward exactly."""
    x = jnp.swapaxes(backbone_features, 2, 1)                    # (B, T, D)
    y_hat = jnp.einsum("btd,od->bto", x, weight) + bias          # shared Linear head
    y_hat = y_hat * eta.reshape(1, -1, 1)
    y_hat = y_hat.sum(axis=1)
    y_hat = y_hat + t0
    return y_hat


if __name__ == "__main__":
    # Small shapes consistent with the module's forward:
    #   batch B=4, input_dim D=32, num_trees T=8, output_dim O=3
    B, D, T, O = 4, 32, 8, 3

    key = jax.random.PRNGKey(0)
    k_x, k_w, k_b, k_eta, k_t0 = jax.random.split(key, 5)

    backbone_features = jax.random.normal(k_x, (B, D, T), dtype=jnp.float32)
    # nn.Linear-style params for the shared head
    weight = jax.random.normal(k_w, (O, D), dtype=jnp.float32) * (1.0 / jnp.sqrt(D))
    bias = jax.random.normal(k_b, (O,), dtype=jnp.float32) * 0.1
    # eta ~ torch.rand(num_trees), T0 ~ torch.rand(output_dim)  -> uniform [0, 1)
    eta = jax.random.uniform(k_eta, (T,), dtype=jnp.float32)
    t0 = jax.random.uniform(k_t0, (O,), dtype=jnp.float32)

    ref = custom_head_reference(backbone_features, weight, bias, eta, t0)

    # 1) f32 path (strict check) at the toy shape — single grid step.
    out = custom_head_forward(backbone_features, weight, bias, eta, t0)
    out = jax.block_until_ready(out)
    assert out.shape == (B, O), out.shape
    assert jnp.allclose(out, ref, atol=1e-4, rtol=1e-4), (out, ref)

    # 2) Exercise a multi-step batch grid (padding + pipelining path).
    B2 = 20
    bf2 = jax.random.normal(jax.random.PRNGKey(1), (B2, D, T), dtype=jnp.float32)
    ref2 = custom_head_reference(bf2, weight, bias, eta, t0)
    out2 = jax.block_until_ready(
        custom_head_forward(bf2, weight, bias, eta, t0, b_tile=8))
    assert out2.shape == (B2, O)
    assert jnp.allclose(out2, ref2, atol=1e-4, rtol=1e-4)

    # 3) bf16-input / f32-accumulate path (the HBM-bound production setting);
    #    looser tolerance for bf16 rounding of inputs.
    out_bf16 = jax.block_until_ready(
        custom_head_forward(backbone_features, weight, bias, eta, t0,
                            compute_dtype=jnp.bfloat16))
    assert out_bf16.shape == (B, O)
    assert jnp.allclose(out_bf16, ref, atol=5e-2, rtol=5e-2), (out_bf16, ref)

    print("KERNEL_OK")
</pallas_src>

<mosaic_0001>
module attributes {stable_mosaic.version = 11 : i64} {
  func.func @_custom_head_kernel(%arg0: i32, %arg1: memref<8x256xf32, #tpu.memory_space<vmem>>, %arg2: memref<256x3xf32, #tpu.memory_space<vmem>>, %arg3: memref<1x3xf32, #tpu.memory_space<vmem>>, %arg4: memref<8x3xf32, #tpu.memory_space<vmem>>) attributes {dimension_semantics = [#tpu.dimension_semantics<parallel>], iteration_bounds = array<i64: 1>, scalar_prefetch = 0 : i64, scratch_operands = 0 : i64, tpu.core_type = #tpu.core_type<tc>, window_params = [{transform_indices = @transform_0, window_bounds = array<i64: 8, 256>}, {pipeline_mode = #tpu.pipeline_mode<synchronous>, transform_indices = @transform_1, window_bounds = array<i64: 256, 3>}, {pipeline_mode = #tpu.pipeline_mode<synchronous>, transform_indices = @transform_2, window_bounds = array<i64: 1, 3>}, {transform_indices = @transform_3, window_bounds = array<i64: 8, 3>}]} {
    %c0 = arith.constant 0 : index
    %c0_0 = arith.constant 0 : index
    %0 = vector.load %arg1[%c0, %c0_0] : memref<8x256xf32, #tpu.memory_space<vmem>>, vector<8x256xf32>
    %c0_1 = arith.constant 0 : index
    %c0_2 = arith.constant 0 : index
    %1 = vector.load %arg2[%c0_1, %c0_2] : memref<256x3xf32, #tpu.memory_space<vmem>>, vector<256x3xf32>
    %cst = arith.constant dense<0.000000e+00> : vector<8x3xf32>
    %2 = tpu.matmul %0, %1, %cst {dimension_numbers = #tpu.dot_dimension_numbers<[1], [0], [0], [1], [0, 0, 1, 1], [], []>} : vector<8x256xf32>, vector<256x3xf32>, vector<8x3xf32> -> vector<8x3xf32>
    %c0_3 = arith.constant 0 : index
    %c0_4 = arith.constant 0 : index
    %3 = vector.load %arg3[%c0_3, %c0_4] : memref<1x3xf32, #tpu.memory_space<vmem>>, vector<1x3xf32>
    %4 = vector.broadcast %3 : vector<1x3xf32> to vector<8x3xf32>
    %5 = arith.addf %2, %4 : vector<8x3xf32>
    %c0_5 = arith.constant 0 : index
    %c0_6 = arith.constant 0 : index
    %6 = vector.load %arg4[%c0_5, %c0_6] : memref<8x3xf32, #tpu.memory_space<vmem>>, vector<8x3xf32>
    tpu.vector_store %arg4[%c0_5, %c0_6], %5 {strides = array<i32>} : memref<8x3xf32, #tpu.memory_space<vmem>>, vector<8x3xf32>,
    return
  }
  func.func @transform_0(%arg0: i32) -> (i32, i32) {
    %c0_i32 = arith.constant 0 : i32
    %c0_i32_0 = arith.constant 0 : i32
    return %arg0, %c0_i32 : i32, i32
  }
  func.func @transform_1(%arg0: i32) -> (i32, i32) {
    %c0_i32 = arith.constant 0 : i32
    %c0_i32_0 = arith.constant 0 : i32
    %c0_i32_1 = arith.constant 0 : i32
    return %c0_i32, %c0_i32_0 : i32, i32
  }
  func.func @transform_2(%arg0: i32) -> (i32, i32) {
    %c0_i32 = arith.constant 0 : i32
    %c0_i32_0 = arith.constant 0 : i32
    %c0_i32_1 = arith.constant 0 : i32
    return %c0_i32, %c0_i32_0 : i32, i32
  }
  func.func @transform_3(%arg0: i32) -> (i32, i32) {
    %c0_i32 = arith.constant 0 : i32
    %c0_i32_0 = arith.constant 0 : i32
    return %arg0, %c0_i32 : i32, i32
  }
}

</mosaic_0001>

<bundles_post_ra>
// kernel: custom_head_forward.1
= control target key start
LH: loop header
LB: loop body
LE: loop exit
PB: predicated region body
PF: predicated region fallthrough
CT: control target
= control target key end

     0   :  { %vm125_vm0 = vcmask 23552   ;;  %s327_s1 = inlined_call_operand.vmem [shape: f32[256,3], index: 1, kind: input, shape index: {}]   ;;  %s328_s0 = inlined_call_operand.vmem [shape: f32[8,256], index: 0, kind: input, shape index: {}]   ;;  %s329_s2 = inlined_call_operand.vmem [shape: f32[1,3], index: 2, kind: input, shape index: {}]   ;;  %s330_s3 = inlined_call_operand.vmem [shape: f32[8,3], index: 3, kind: output, shape index: {}]  }
   0x1   :  { %v32_v0 = vld [vmem:[%s327_s1 + $0x80] sm:$0xff]  ;;  %v33_v1 = vld [vmem:[%s327_s1 + $0x88] sm:$0xff]  ;;  %v34_v5 = vld [vmem:[%s327_s1 + $0x90] sm:$0xff] }
   0x2   :  { %v16_v2 = vld [vmem:[%s327_s1] sm:$0xff]  ;;  %v167_v3 = vpack.c.bf16 %v33_v1, %v32_v0  ;;  %v17_v4 = vld [vmem:[%s327_s1 + $0x8] sm:$0xff]  ;;  %v35_v6 = vld [vmem:[%s327_s1 + $0x98] sm:$0xff] }
   0x3   :  { %v169_v7 = vpack.c.bf16 %v17_v4, %v16_v2  ;;  %v171_v8 = vpack.c.bf16 %v35_v6, %v34_v5  ;;  %v18_v9 = vld [vmem:[%s327_s1 + $0x10] sm:$0xff]  ;;  %v19_v10 = vld [vmem:[%s327_s1 + $0x18] sm:$0xff]  ;;  %v36_v11 = vld [vmem:[%s327_s1 + $0xa0] sm:$0xff] }
   0x4   :  { %168 = vmatprep.subr.bf16.mxu0 %v167_v3  ;;  %v37_v12 = vld [vmem:[%s327_s1 + $0xa8] sm:$0xff]  ;;  %v173_v13 = vpack.c.bf16 %v19_v10, %v18_v9  ;;  %v20_v15 = vld [vmem:[%s327_s1 + $0x20] sm:$0xff]  ;;  %v38_v17 = vld [vmem:[%s327_s1 + $0xb0] sm:$0xff] }
   0x5   :  { %170 = vmatpush3.bf16.msra.mxu0 %v169_v7  ;;  %v175_v14 = vpack.c.bf16 %v37_v12, %v36_v11  ;;  %v21_v16 = vld [vmem:[%s327_s1 + $0x28] sm:$0xff]  ;;  %v39_v18 = vld [vmem:[%s327_s1 + $0xb8] sm:$0xff]  ;;  %v22_v21 = vld [vmem:[%s327_s1 + $0x30] sm:$0xff] }
   0x6   :  { %172 = vmatprep.subr.bf16.mxu0 %v171_v8  ;;  %v177_v19 = vpack.c.bf16 %v21_v16, %v20_v15  ;;  %v179_v20 = vpack.c.bf16 %v39_v18, %v38_v17  ;;  %v23_v22 = vld [vmem:[%s327_s1 + $0x38] sm:$0xff]  ;;  %v40_v23 = vld [vmem:[%s327_s1 + $0xc0] sm:$0xff]  ;;  %v41_v24 = vld [vmem:[%s327_s1 + $0xc8] sm:$0xff] }
   0x7   :  { %v15_v25 = vld [vmem:[%s328_s0 + $0x8] sm:$0xff]  ;;  %v181_v26 = vpack.c.bf16 %v23_v22, %v22_v21  ;;  %v183_v27 = vpack.c.bf16 %v41_v24, %v40_v23  ;;  %v24_v28 = vld [vmem:[%s327_s1 + $0x40] sm:$0xff]  ;;  %v42_v30 = vld [vmem:[%s327_s1 + $0xd0] sm:$0xff] }
   0x8   :  { %119 = vmatprep.mubr.f32.mxu0 %v15_v25  ;;  %v25_v29 = vld [vmem:[%s327_s1 + $0x48] sm:$0xff]  ;;  %v43_v31 = vld [vmem:[%s327_s1 + $0xd8] sm:$0xff]  ;;  %v26_v34 = vld [vmem:[%s327_s1 + $0x50] sm:$0xff] }
   0x9   :  { %174 = vmatpush3.bf16.msra.mxu0 %v173_v13  ;;  %v185_v32 = vpack.c.bf16 %v25_v29, %v24_v28  ;;  %v187_v33 = vpack.c.bf16 %v43_v31, %v42_v30  ;;  %v27_v35 = vld [vmem:[%s327_s1 + $0x58] sm:$0xff]  ;;  %v44_v36 = vld [vmem:[%s327_s1 + $0xe0] sm:$0xff]  ;;  %v45_v37 = vld [vmem:[%s327_s1 + $0xe8] sm:$0xff] }
   0xa   :  { %176 = vmatprep.subr.bf16.mxu0 %v175_v14  ;;  %v189_v38 = vpack.c.bf16 %v27_v35, %v26_v34  ;;  %v191_v39 = vpack.c.bf16 %v45_v37, %v44_v36  ;;  %v28_v40 = vld [vmem:[%s327_s1 + $0x60] sm:$0xff]  ;;  %v29_v41 = vld [vmem:[%s327_s1 + $0x68] sm:$0xff]  ;;  %v46_v42 = vld [vmem:[%s327_s1 + $0xf0] sm:$0xff] }
   0xb   :  { %v47_v43 = vld [vmem:[%s327_s1 + $0xf8] sm:$0xff]  ;;  %v193_v44 = vpack.c.bf16 %v29_v41, %v28_v40  ;;  %v30_v46 = vld [vmem:[%s327_s1 + $0x70] sm:$0xff]  ;;  %v14_v49 = vld [vmem:[%s328_s0] sm:$0xff] }
   0xc   :  { %v195_v45 = vpack.c.bf16 %v47_v43, %v46_v42  ;;  %v31_v47 = vld [vmem:[%s327_s1 + $0x78] sm:$0xff]  ;;  %v131_v51 = vld [vmem:[%s329_s2] ss:$0 sm:$0xff] }
   0xd   :  { %178 = vmatpush3.bf16.msra.mxu0 %v177_v19  ;;  %v197_v48 = vpack.c.bf16 %v31_v47, %v30_v46 }
   0xe   :  { %180 = vmatprep.subr.bf16.mxu0 %v179_v20 }
  0x11   :  { %182 = vmatpush3.bf16.msra.mxu0 %v181_v26 }
  0x12   :  { %184 = vmatprep.subr.bf16.mxu0 %v183_v27 }
  0x15   :  { %186 = vmatpush3.bf16.msra.mxu0 %v185_v32 }
  0x16   :  { %188 = vmatprep.subr.bf16.mxu0 %v187_v33 }
  0x19   :  { %190 = vmatpush3.bf16.msra.mxu0 %v189_v38 }
  0x1a   :  { %192 = vmatprep.subr.bf16.mxu0 %v191_v39 }
  0x1d   :  { %194 = vmatpush3.bf16.msra.mxu0 %v193_v44 }
  0x1e   :  { %196 = vmatprep.subr.bf16.mxu0 %v195_v45 }
  0x21   :  { %198 = vmatpush3.bf16.msra.mxu0 %v197_v48 }
  0x24   :  { %120 = vmatmul.mubr.f32.vlgmr.msra.gmra.mrb[0].mxu0 %v14_v49 }
  0xf7   :  { %v164_v50 = vpop.f32.mrb[0].mxu0 }
  0xf8   :  { %v165_v52 = vpop.f32.mrb[1].mxu0 }
  0xf9   :  { %v166_v53 = vadd.f32 %v165_v52, %v164_v50 }
  0xfb   :  { %v122_v54 = vadd.f32 %v166_v53, %v131_v51 }
  0xfd   :  { %126 = vst.msk [vmem:[%s330_s3] sm:$0xff] %vm125_vm0, %v122_v54 }

</bundles_post_ra>
